<compile_context>
chip_gen: v7x
topology: tpu7x:2x2x1
jax: 0.10.0
libtpu: 0.0.40
codegen_flags: <defaults>
</compile_context>

<pallas_src>
import functools
import math

import jax
import jax.numpy as jnp
import numpy as np
from jax.experimental import pallas as pl
from jax.experimental.pallas import tpu as pltpu

EPS = 1e-6
_MAX_TILE_ROWS = 1024  # ~1024 x padded-D x 4B per buffer -> well under scoped VMEM


# ----------------------------- kernel ----------------------------------------

def _layernorm_kernel(x_ref, a_ref, b_ref, o_ref, *, eps):
    x = x_ref[...].astype(jnp.float32)            # (tile_n, D)
    d = x.shape[-1]
    mean = jnp.mean(x, axis=-1, keepdims=True)
    diff = x - mean
    # torch.Tensor.std() default is the unbiased estimator (divide by d-1).
    dof = d - 1 if d > 1 else 1                   # guard d == 1
    var = jnp.sum(diff * diff, axis=-1, keepdims=True) * (1.0 / dof)
    std = jnp.sqrt(var)
    denom = std + eps
    # EUP approximate reciprocal (own VLIW slot) + one Newton step for f32 accuracy.
    inv = pl.reciprocal(denom, approx=True)
    inv = inv * (2.0 - denom * inv)
    y = a_ref[...] * (diff * inv) + b_ref[...]    # params already f32 (1, D)
    o_ref[...] = y.astype(o_ref.dtype)


# ----------------------------- wrapper ----------------------------------------

def layernorm(x, a2, b2, *, eps=EPS, tile_rows=None):
    """LayerNorm over the last axis of x (any leading shape)."""
    orig_shape = x.shape
    d = orig_shape[-1]
    n = math.prod(orig_shape[:-1]) if len(orig_shape) > 1 else 1
    x2d = x.reshape(n, d)
    a2 = a2.astype(jnp.float32).reshape(1, d)     # hoist casts out of the kernel
    b2 = b2.astype(jnp.float32).reshape(1, d)

    if tile_rows is None:
        tile_rows = _MAX_TILE_ROWS
    tile_n = n if n <= tile_rows else tile_rows
    # (8,128) rule: second-to-last block dim must be a multiple of 8 or the full dim.
    if tile_n != n and tile_n % 8 != 0:
        tile_n = max(8, (tile_n // 8) * 8)

    grid = (pl.cdiv(n, tile_n),)
    kern = functools.partial(_layernorm_kernel, eps=eps)
    out = pl.pallas_call(
        kern,
        out_shape=jax.ShapeDtypeStruct((n, d), x.dtype),
        grid=grid,
        in_specs=[pl.BlockSpec((tile_n, d), lambda i: (i, 0)),
                  pl.BlockSpec((1, d), lambda i: (0, 0)),
                  pl.BlockSpec((1, d), lambda i: (0, 0))],
        out_specs=pl.BlockSpec((tile_n, d), lambda i: (i, 0)),
        compiler_params=pltpu.CompilerParams(
            dimension_semantics=("parallel",),       # shard rows across TCs (v7x)
            vmem_limit_bytes=32 * 1024 * 1024,       # tiles are a few MiB; safe on all gens
        ),
    )(x2d, a2, b2)
    return out.reshape(orig_shape)


# ----------------------------- reference ---------------------------------------

def _ref_layernorm(x, a2, b2, eps=EPS):
    mean = x.mean(axis=-1, keepdims=True)
    d = x.shape[-1]
    var = jnp.sum((x - mean) ** 2, axis=-1, keepdims=True) / max(d - 1, 1)
    std = jnp.sqrt(var)
    return a2 * (x - mean) / (std + eps) + b2


# ------------------------------- main -------------------------------------------

if __name__ == "__main__":
    B, S, D = 2, 8, 32
    key = jax.random.PRNGKey(0)
    kx, ka, kb = jax.random.split(key, 3)

    x = jax.random.normal(kx, (B, S, D), dtype=jnp.float32) * 2.0 + 0.5
    # Module init is a_2 = ones, b_2 = zeros; use non-trivial params to exercise
    # the affine path as well.
    a2 = 1.0 + 0.1 * jax.random.normal(ka, (D,), dtype=jnp.float32)
    b2 = 0.1 * jax.random.normal(kb, (D,), dtype=jnp.float32)

    ref = _ref_layernorm(x, a2, b2)

    # 1) default tile (small case collapses to a single block)
    out = jax.block_until_ready(layernorm(x, a2, b2))
    np.testing.assert_allclose(np.asarray(out), np.asarray(ref), rtol=1e-4, atol=1e-4)

    # 2) force multi-block row tiling (grid > 1) to exercise the pipelined path
    out_tiled = jax.block_until_ready(layernorm(x, a2, b2, tile_rows=8))
    np.testing.assert_allclose(np.asarray(out_tiled), np.asarray(ref), rtol=1e-4, atol=1e-4)

    print("KERNEL_OK")
</pallas_src>

<mosaic_0001>
module attributes {stable_mosaic.version = 11 : i64} {
  func.func @_layernorm_kernel(%arg0: i32, %arg1: memref<16x32xf32, #tpu.memory_space<vmem>>, %arg2: memref<1x32xf32, #tpu.memory_space<vmem>>, %arg3: memref<1x32xf32, #tpu.memory_space<vmem>>, %arg4: memref<16x32xf32, #tpu.memory_space<vmem>>) attributes {dimension_semantics = [#tpu.dimension_semantics<parallel>], iteration_bounds = array<i64: 1>, scalar_prefetch = 0 : i64, scratch_operands = 0 : i64, tpu.core_type = #tpu.core_type<tc>, window_params = [{transform_indices = @transform_0, window_bounds = array<i64: 16, 32>}, {pipeline_mode = #tpu.pipeline_mode<synchronous>, transform_indices = @transform_1, window_bounds = array<i64: 1, 32>}, {pipeline_mode = #tpu.pipeline_mode<synchronous>, transform_indices = @transform_2, window_bounds = array<i64: 1, 32>}, {transform_indices = @transform_3, window_bounds = array<i64: 16, 32>}]} {
    %c0 = arith.constant 0 : index
    %c0_0 = arith.constant 0 : index
    %0 = vector.load %arg1[%c0, %c0_0] : memref<16x32xf32, #tpu.memory_space<vmem>>, vector<16x32xf32>
    %cst = arith.constant dense<0.000000e+00> : vector<16xf32>
    %1 = vector.multi_reduction <add>, %0, %cst [1] : vector<16x32xf32> to vector<16xf32>
    %2 = vector.shape_cast %1 : vector<16xf32> to vector<16x1xf32>
    %cst_1 = arith.constant 3.200000e+01 : f32
    %3 = vector.broadcast %cst_1 : f32 to vector<16x1xf32>
    %4 = arith.divf %2, %3 : vector<16x1xf32>
    %5 = vector.broadcast %4 : vector<16x1xf32> to vector<16x32xf32>
    %6 = arith.subf %0, %5 : vector<16x32xf32>
    %7 = arith.mulf %6, %6 : vector<16x32xf32>
    %cst_2 = arith.constant dense<0.000000e+00> : vector<16xf32>
    %8 = vector.multi_reduction <add>, %7, %cst_2 [1] : vector<16x32xf32> to vector<16xf32>
    %9 = vector.shape_cast %8 : vector<16xf32> to vector<16x1xf32>
    %cst_3 = arith.constant 0.0322580636 : f32
    %10 = vector.broadcast %cst_3 : f32 to vector<16x1xf32>
    %11 = arith.mulf %9, %10 : vector<16x1xf32>
    %12 = math.sqrt %11 : vector<16x1xf32>
    %cst_4 = arith.constant 9.99999997E-7 : f32
    %13 = vector.broadcast %cst_4 : f32 to vector<16x1xf32>
    %14 = arith.addf %12, %13 : vector<16x1xf32>
    %15 = tpu.reciprocal %14 {approx = true} : vector<16x1xf32> -> vector<16x1xf32>
    %16 = arith.mulf %14, %15 : vector<16x1xf32>
    %cst_5 = arith.constant 2.000000e+00 : f32
    %17 = vector.broadcast %cst_5 : f32 to vector<16x1xf32>
    %18 = arith.subf %17, %16 : vector<16x1xf32>
    %19 = arith.mulf %15, %18 : vector<16x1xf32>
    %c0_6 = arith.constant 0 : index
    %c0_7 = arith.constant 0 : index
    %20 = vector.load %arg2[%c0_6, %c0_7] : memref<1x32xf32, #tpu.memory_space<vmem>>, vector<1x32xf32>
    %21 = vector.broadcast %19 : vector<16x1xf32> to vector<16x32xf32>
    %22 = arith.mulf %6, %21 : vector<16x32xf32>
    %23 = vector.broadcast %20 : vector<1x32xf32> to vector<16x32xf32>
    %24 = arith.mulf %23, %22 : vector<16x32xf32>
    %c0_8 = arith.constant 0 : index
    %c0_9 = arith.constant 0 : index
    %25 = vector.load %arg3[%c0_8, %c0_9] : memref<1x32xf32, #tpu.memory_space<vmem>>, vector<1x32xf32>
    %26 = vector.broadcast %25 : vector<1x32xf32> to vector<16x32xf32>
    %27 = arith.addf %24, %26 : vector<16x32xf32>
    %c0_10 = arith.constant 0 : index
    %c0_11 = arith.constant 0 : index
    %28 = vector.load %arg4[%c0_10, %c0_11] : memref<16x32xf32, #tpu.memory_space<vmem>>, vector<16x32xf32>
    tpu.vector_store %arg4[%c0_10, %c0_11], %27 {strides = array<i32>} : memref<16x32xf32, #tpu.memory_space<vmem>>, vector<16x32xf32>,
    return
  }
  func.func @transform_0(%arg0: i32) -> (i32, i32) {
    %c0_i32 = arith.constant 0 : i32
    %c0_i32_0 = arith.constant 0 : i32
    return %arg0, %c0_i32 : i32, i32
  }
  func.func @transform_1(%arg0: i32) -> (i32, i32) {
    %c0_i32 = arith.constant 0 : i32
    %c0_i32_0 = arith.constant 0 : i32
    %c0_i32_1 = arith.constant 0 : i32
    return %c0_i32, %c0_i32_0 : i32, i32
  }
  func.func @transform_2(%arg0: i32) -> (i32, i32) {
    %c0_i32 = arith.constant 0 : i32
    %c0_i32_0 = arith.constant 0 : i32
    %c0_i32_1 = arith.constant 0 : i32
    return %c0_i32, %c0_i32_0 : i32, i32
  }
  func.func @transform_3(%arg0: i32) -> (i32, i32) {
    %c0_i32 = arith.constant 0 : i32
    %c0_i32_0 = arith.constant 0 : i32
    return %arg0, %c0_i32 : i32, i32
  }
}

</mosaic_0001>

<bundles_post_ra>
// kernel: tpu_custom_call.1
= control target key start
LH: loop header
LB: loop body
LE: loop exit
PB: predicated region body
PF: predicated region fallthrough
CT: control target
= control target key end

     0   :  { %8 = vsyncpa [#allocation3], 0  ;;  %s244_s0 = inlined_call_operand.hbm [shape: f32[16,32], index: 0, kind: input, shape index: {}]   ;;  %s245_s1 = inlined_call_operand.vmem [shape: f32[1,32], index: 1, kind: input, shape index: {}]   ;;  %s246_s2 = inlined_call_operand.vmem [shape: f32[1,32], index: 2, kind: input, shape index: {}]   ;;  %s247_s3 = inlined_call_operand.hbm [shape: f32[16,32], index: 3, kind: output, shape index: {}]  }
   0x1   :  { %9 = vsyncpa [#allocation4], 0  ;;  %s178_s12 = smov [#allocation2]   ;;  %s130_s16 = scalar_lea.hbm %s244_s0, 256 }
   0x2   :  { %s15_s13 = sshll.u32 %s178_s12, 4  ;;  %p131_p0 = scmp.ne.s32.totalorder %s244_s0, %s130_s16  ;;  %s16_s13 = int_to_ptr.vmem [resolvable:$true] %s15_s13 }
   0x3   :  { %p134_p1 = scmp.lt.u32.totalorder %s130_s16, %s244_s0 }
   0x5   :  { %p136_p2 = pnand %p134_p1, %p131_p0 }
   0x7   :  { %139 = shalt.err (!%p136_p2)
}
   0x8   :  { %s140_s21 = scalar_lea.vmem %s16_s13, 256  ;;  %p145_p4 = scmp.lt.s32.totalorder %s16_s13, %s16_s13 }
   0x9   :  { %p141_p3 = scmp.ne.s32.totalorder %s16_s13, %s140_s21  ;;  %p146_p5 = scmp.lt.s32.totalorder %s140_s21, %s140_s21 }
   0xb   :  { %p147_p6 = por %p146_p5, %p145_p4 }
   0xd   :  { %p148_p7 = pnand %p147_p6, %p141_p3 }
   0xf   :  { %151 = shalt.err (!%p148_p7)
}
  0x10   :  { %s179_s22 = smov 128   ;;  %s180_s23 = smov 8  }
  0x11   :  { %21 = dma.hbm_to_vmem [thread:$0]  %s244_s0, 256, %s16_s13, [#allocation3], %s179_s22, %s179_s22, %s180_s23  }
  0x12   :  { %174 = dma.done.wait [#allocation3], 256  }
  0x13   :  { %175 = vsyncadd [#allocation3], 4294967040  ;;  %vm31_vm0 = vcmask 261120   ;;  %v29_v0 = vld [vmem:[#allocation2] sm:$0xff]  ;;  %v30_v1 = vld [vmem:[#allocation2 + $0x8] sm:$0xff]  ;;  %s181_s29 = smov [#allocation5]  }
  0x14   :  { %v32_v2 = vsel %vm31_vm0, %v29_v0, 0.0  ;;  %v35_v3 = vsel %vm31_vm0, %v30_v1, 0.0  ;;  %v116_v36 = vld [vmem:[%s245_s1] ss:$0 sm:$0xff]  ;;  %s104_s30 = sshll.u32 %s181_s29, 4  ;;  %s105_s30 = int_to_ptr.vmem [resolvable:$true] %s104_s30 }
  0x15   :  { %33 = vadd.xlane.f32.xlu0 %v32_v2  ;;  %v117_v39 = vld [vmem:[%s246_s2] ss:$0 sm:$0xff]  ;;  %s152_s1 = scalar_lea.vmem %s105_s30, 256  ;;  %p157_p9 = scmp.lt.s32.totalorder %s105_s30, %s105_s30 }
  0x16   :  { %p153_p8 = scmp.ne.s32.totalorder %s105_s30, %s152_s1  ;;  %p158_p10 = scmp.lt.s32.totalorder %s152_s1, %s152_s1 }
  0x18   :  { %p159_p11 = por %p158_p10, %p157_p9 }
  0x19   :  { %36 = vadd.xlane.f32.xlu0 %v35_v3 }
  0x1a   :  { %p160_p12 = pnand %p159_p11, %p153_p8 }
  0xa2   :  { %v34_v4 = vpop.xlane.xlu0 %33 }
  0xa3   :  { %v39_v5 = vmul.f32 0.03125, %v34_v4 }
  0xa5   :  { %v41_v6 = vsub.f32 %v29_v0, %v39_v5 }
  0xa6   :  { %v37_v7 = vpop.xlane.xlu0 %36 }
  0xa7   :  { %v40_v8 = vmul.f32 0.03125, %v37_v7  ;;  %v43_v9 = vmul.f32 %v41_v6, %v41_v6 }
  0xa9   :  { %v42_v10 = vsub.f32 %v30_v1, %v40_v8  ;;  %v45_v11 = vsel %vm31_vm0, %v43_v9, 0.0 }
  0xaa   :  { %46 = vadd.xlane.f32.xlu1 %v45_v11 }
  0xab   :  { %v44_v12 = vmul.f32 %v42_v10, %v42_v10 }
  0xad   :  { %v48_v13 = vsel %vm31_vm0, %v44_v12, 0.0 }
  0xae   :  { %49 = vadd.xlane.f32.xlu1 %v48_v13 }
 0x137   :  { %v47_v14 = vpop.xlane.xlu1 %46 }
 0x138   :  { %v51_v15 = vmul.f32 0.032258064, %v47_v14 }
 0x13a   :  { %122 = vrsqrt.f32 %v51_v15  ;;  %vm55_vm1 = vcmp.eq.f32.partialorder %v51_v15, inf  ;;  %v58_v20 = vand.u32 2147483648, %v51_v15  ;;  %vm57_vm2 = vcmp.eq.f32.partialorder %v51_v15, 0.0 }
 0x13b   :  { %v50_v16 = vpop.xlane.xlu1 %49 }
 0x13c   :  { %v52_v17 = vmul.f32 0.032258064, %v50_v16 }
 0x13e   :  { %124 = vrsqrt.f32 %v52_v17  ;;  %vm62_vm3 = vcmp.eq.f32.partialorder %v52_v17, inf  ;;  %v65_v26 = vand.u32 2147483648, %v52_v17  ;;  %vm64_vm4 = vcmp.eq.f32.partialorder %v52_v17, 0.0 }
 0x144   :  { %v123_v18 = vpop.eup %122 }
 0x145   :  { %v54_v19 = vmul.f32 %v123_v18, %v51_v15 }
 0x147   :  { %v56_v21 = vsel %vm55_vm1, %v51_v15, %v54_v19 }
 0x148   :  { %v125_v22 = vpop.eup %124  ;;  %v59_v23 = vsel %vm57_vm2, %v58_v20, %v56_v21 }
 0x149   :  { %v61_v24 = vmul.f32 %v125_v22, %v52_v17  ;;  %v67_v25 = vadd.f32 1e-06, %v59_v23 }
 0x14b   :  { %v63_v27 = vsel %vm62_vm3, %v52_v17, %v61_v24  ;;  %126 = vrcp.f32 %v67_v25 }
 0x14c   :  { %v66_v28 = vsel %vm64_vm4, %v65_v26, %v63_v27 }
 0x14d   :  { %v68_v29 = vadd.f32 1e-06, %v66_v28 }
 0x14f   :  { %128 = vrcp.f32 %v68_v29 }
 0x155   :  { %v127_v30 = vpop.eup %126 }
 0x156   :  { %v71_v31 = vmul.f32 %v127_v30, %v67_v25 }
 0x158   :  { %v73_v32 = vsub.f32 2.0, %v71_v31 }
 0x159   :  { %v129_v33 = vpop.eup %128 }
 0x15a   :  { %v72_v34 = vmul.f32 %v129_v33, %v68_v29  ;;  %v75_v35 = vmul.f32 %v127_v30, %v73_v32 }
 0x15c   :  { %v74_v37 = vsub.f32 2.0, %v72_v34  ;;  %v78_v38 = vmul.f32 %v75_v35, %v41_v6 }
 0x15e   :  { %v76_v40 = vmul.f32 %v129_v33, %v74_v37  ;;  %v86_v41 = vmul.f32 %v116_v36, %v78_v38 }
 0x160   :  { %v79_v42 = vmul.f32 %v76_v40, %v42_v10  ;;  %v95_v43 = vadd.f32 %v117_v39, %v86_v41 }
 0x162   :  { %v87_v44 = vmul.f32 %v116_v36, %v79_v42  ;;  %97 = vst.msk [vmem:[#allocation5] sm:$0xff] %vm31_vm0, %v95_v43 }
 0x164   :  { %v96_v45 = vadd.f32 %v117_v39, %v87_v44 }
 0x166   :  { %98 = vst.msk [vmem:[#allocation5 + $0x8] sm:$0xff] %vm31_vm0, %v96_v45 }
 0x167   :  { %163 = shalt.err (!%p160_p12)
}
 0x168   :  { %s164_s5 = scalar_lea.hbm %s247_s3, 256 }
 0x169   :  { %p165_p13 = scmp.ne.s32.totalorder %s247_s3, %s164_s5  ;;  %p168_p0 = scmp.lt.u32.totalorder %s164_s5, %s247_s3 }
 0x16b   :  { %p170_p1 = pnand %p168_p0, %p165_p13 }
 0x16d   :  { %173 = shalt.err (!%p170_p1)
}
 0x16e   :  { %110 = dma.vmem_to_hbm [thread:$0]  %s105_s30, 256, %s247_s3, [#allocation4], %s179_s22, %s179_s22, %s180_s23  }
 0x16f   :  { %176 = dma.done.wait [#allocation4], 256  }
 0x170   :  { %177 = vsyncadd [#allocation4], 4294967040 }
 0x171   :  { %114 = vsyncpa [#allocation3], 1 }
 0x172   :  { %115 = vsyncpa [#allocation4], 1 }

</bundles_post_ra>
